<compile_context>
chip_gen: v6e
topology: v6e:2x2x1
jax: 0.10.0
libtpu: 0.0.40
codegen_flags: <defaults>
</compile_context>

<pallas_src>
import jax
import jax.numpy as jnp
from jax import lax
from jax.experimental import pallas as pl
from jax.experimental.pallas import tpu as pltpu

# ------------------------- configs (synthetic) -------------------------
SEQ_LEN = 16      # configs.seq_len
PRED_LEN = 8      # configs.pred_len
ENC_IN = 4        # configs.enc_in
CYCLE_LEN = 6     # configs.cycle
D_MODEL = 32      # configs.d_model
MODEL_TYPE = "mlp"   # 'mlp' branch: Linear -> ReLU -> Linear
USE_REVIN = True
EPS = 1e-5
LANE = 128        # target lane width for batch packing (use 256 to feed a full
                  # v6e/v7x MXU pass once B is large enough)


def cyclenet_kernel(x_ref, xdec_ref, pseq_ref, ppred_ref, ctab_ref,
                    w1_ref, b1_ref, w2_ref, b2_ref, out_ref):
    # Per-group views; N = TB*C lanes (batch*channel packed on the lane axis).
    x = x_ref[0]          # (S, N) f32
    xdec = xdec_ref[0]    # (P, N) f32
    ps = pseq_ref[0]      # (1, N) int32   cycle phase per lane (seq window)
    pp = ppred_ref[0]     # (1, N) int32   cycle phase per lane (pred window)
    ctab = ctab_ref[...]  # (CY, N) f32    cycle table, tiled across lanes

    S, N = x.shape
    P = xdec.shape[0]
    CY = ctab.shape[0]

    # ---- RevIN normalization (torch.var is unbiased: divide by S-1) ----
    seq_mean = jnp.mean(x, axis=0, keepdims=True)                               # (1, N)
    seq_var = jnp.sum((x - seq_mean) ** 2, axis=0, keepdims=True) * (1.0 / (S - 1)) + EPS
    seq_std = jnp.sqrt(seq_var)                                                 # (1, N)
    xn = (x - seq_mean) / seq_std                                               # (S, N)

    # ---- in-kernel RecurrentCycle gather ----
    # index[s, lane] = (phase[lane] + s) mod CY, built with iota + static
    # conditional subtracts; gather = CY compare+selects against table rows.
    def gather_cycle(phase, L):
        idx = phase + lax.broadcasted_iota(jnp.int32, (L, N), 0)
        for _ in range((CY - 1 + L - 1) // CY):            # static trip count
            idx = jnp.where(idx >= CY, idx - CY, idx)
        out = jnp.zeros((L, N), jnp.float32)
        for k in range(CY):                                # CY = 6, unrolled
            out = jnp.where(idx == k, ctab[k:k + 1, :], out)
        return out

    xn = xn - gather_cycle(ps, S)                                               # (S, N)

    # ---- MLP over the time axis (Linear(S->D) -> ReLU -> Linear(D->P)) ----
    # Transposed form keeps batch*channel on the lane axis: wide MXU N, no permutes.
    h = jnp.dot(w1_ref[...], xn, preferred_element_type=jnp.float32) + b1_ref[...]   # (D, N)
    h = jnp.maximum(h, 0.0)
    trend_pred = jnp.dot(w2_ref[...], h, preferred_element_type=jnp.float32) + b2_ref[...]  # (P, N)

    # ---- add cycle back / build trend_true ----
    cpred = gather_cycle(pp, P)                                                 # (P, N)
    y = trend_pred + cpred
    trend_true = xdec - cpred

    # ---- RevIN de-normalization; fused lane-dense output slab (3P, N) ----
    out_ref[0, 0:P, :] = y * seq_std + seq_mean
    out_ref[0, P:2 * P, :] = trend_pred * seq_std + seq_mean
    out_ref[0, 2 * P:3 * P, :] = trend_true * seq_std + seq_mean


def cyclenet_forward(x, x_dec, cycle_index, params):
    """x: (B, S, C) f32; x_dec: (B, >=P, C) f32; cycle_index: (B,) int32."""
    B, S, C = x.shape
    P, D, CY = PRED_LEN, D_MODEL, CYCLE_LEN
    cycle_data, w1, b1, w2, b2 = (params["cycle"], params["w1"], params["b1"],
                                  params["w2"], params["b2"])

    # ---- batch packing onto the lane axis: (B, L, C) -> (G, L, TB*C) ----
    TB = max(1, LANE // C)
    G = (B + TB - 1) // TB
    Bp = G * TB
    pad = Bp - B
    N = TB * C

    xdec_tail = x_dec[:, -P:, :]                     # fuses with the pack transpose
    if pad:
        x = jnp.pad(x, ((0, pad), (0, 0), (0, 0)))
        xdec_tail = jnp.pad(xdec_tail, ((0, pad), (0, 0), (0, 0)))
        cycle_index = jnp.pad(cycle_index, (0, pad))

    def pack(a):  # (Bp, L, C) -> (G, L, TB*C);  lane = t*C + c, batch b = g*TB + t
        L = a.shape[1]
        return a.reshape(G, TB, L, C).transpose(0, 2, 1, 3).reshape(G, L, N)

    x_p = pack(x)
    xd_p = pack(xdec_tail)

    # tiny per-lane cycle phases + lane-tiled cycle table (no (B,S,C) gathers in HBM)
    ps = (cycle_index % CY).astype(jnp.int32)
    pp = ((cycle_index + S) % CY).astype(jnp.int32)
    ps_lane = jnp.repeat(ps, C).reshape(G, 1, N)     # (G, 1, N) int32
    pp_lane = jnp.repeat(pp, C).reshape(G, 1, N)
    ctab = jnp.tile(cycle_data, (1, TB))             # (CY, N) f32, ~3 KB

    out_p = pl.pallas_call(
        cyclenet_kernel,
        out_shape=jax.ShapeDtypeStruct((G, 3 * P, N), jnp.float32),
        grid_spec=pltpu.PrefetchScalarGridSpec(
            num_scalar_prefetch=0,
            grid=(G,),
            in_specs=[
                pl.BlockSpec((1, S, N), lambda g: (g, 0, 0)),   # x packed
                pl.BlockSpec((1, P, N), lambda g: (g, 0, 0)),   # x_dec tail packed
                pl.BlockSpec((1, 1, N), lambda g: (g, 0, 0)),   # phase (seq)
                pl.BlockSpec((1, 1, N), lambda g: (g, 0, 0)),   # phase (pred)
                pl.BlockSpec((CY, N), lambda g: (0, 0)),        # cycle table (tiled)
                pl.BlockSpec((D, S), lambda g: (0, 0)),         # W1
                pl.BlockSpec((D, 1), lambda g: (0, 0)),         # b1 (column)
                pl.BlockSpec((P, D), lambda g: (0, 0)),         # W2
                pl.BlockSpec((P, 1), lambda g: (0, 0)),         # b2 (column)
            ],
            out_specs=pl.BlockSpec((1, 3 * P, N), lambda g: (g, 0, 0)),
        ),
        compiler_params=pltpu.CompilerParams(dimension_semantics=("parallel",)),
    )(x_p, xd_p, ps_lane, pp_lane, ctab, w1, b1, w2, b2)

    def unpack(a):  # (G, P, N) -> (B, P, C)
        return a.reshape(G, P, TB, C).transpose(0, 2, 1, 3).reshape(Bp, P, C)[:B]

    y = unpack(out_p[:, 0:P])
    tp = unpack(out_p[:, P:2 * P])
    tt = unpack(out_p[:, 2 * P:3 * P])
    return y, tp, tt


def reference_forward(x, x_dec, cycle_index, params):
    """Pure-JAX reference mirroring the PyTorch module."""
    B, S, C = x.shape
    P, CY = PRED_LEN, CYCLE_LEN
    cycle_data, w1, b1, w2, b2 = (params["cycle"], params["w1"], params["b1"],
                                  params["w2"], params["b2"])
    seq_mean = jnp.mean(x, axis=1, keepdims=True)
    seq_var = jnp.var(x, axis=1, keepdims=True, ddof=1) + EPS
    xn = (x - seq_mean) / jnp.sqrt(seq_var)

    idx_seq = (cycle_index[:, None] + jnp.arange(S)) % CY
    idx_pred = ((cycle_index + S) % CY)[:, None] + jnp.arange(P)
    idx_pred = idx_pred % CY
    xn = xn - cycle_data[idx_seq]

    xp = jnp.transpose(xn, (0, 2, 1))                 # (B, C, S)
    h = jnp.maximum(jnp.einsum("bcs,ds->bcd", xp, w1) + b1[:, 0], 0.0)
    yp = jnp.einsum("bcd,pd->bcp", h, w2) + b2[:, 0]
    trend_pred = jnp.transpose(yp, (0, 2, 1))          # (B, P, C)

    trend_true = x_dec[:, -P:, :] - cycle_data[idx_pred]
    y = trend_pred + cycle_data[idx_pred]

    std = jnp.sqrt(seq_var)
    return (y * std + seq_mean, trend_pred * std + seq_mean, trend_true * std + seq_mean)


if __name__ == "__main__":
    key = jax.random.PRNGKey(0)
    k = jax.random.split(key, 8)

    B = 2
    x = jax.random.normal(k[0], (B, SEQ_LEN, ENC_IN), dtype=jnp.float32)
    x_dec = jax.random.normal(k[1], (B, PRED_LEN + 4, ENC_IN), dtype=jnp.float32)
    cycle_index = jax.random.randint(k[2], (B,), 0, CYCLE_LEN, dtype=jnp.int32)

    params = {
        "cycle": jax.random.normal(k[3], (CYCLE_LEN, ENC_IN), dtype=jnp.float32),
        "w1": jax.random.normal(k[4], (D_MODEL, SEQ_LEN), dtype=jnp.float32) * 0.1,
        "b1": jax.random.normal(k[5], (D_MODEL, 1), dtype=jnp.float32) * 0.1,
        "w2": jax.random.normal(k[6], (PRED_LEN, D_MODEL), dtype=jnp.float32) * 0.1,
        "b2": jax.random.normal(k[7], (PRED_LEN, 1), dtype=jnp.float32) * 0.1,
    }

    y, tp, tt = cyclenet_forward(x, x_dec, cycle_index, params)
    jax.block_until_ready((y, tp, tt))

    ry, rtp, rtt = reference_forward(x, x_dec, cycle_index, params)
    assert jnp.allclose(y, ry, atol=1e-4, rtol=1e-4)
    assert jnp.allclose(tp, rtp, atol=1e-4, rtol=1e-4)
    assert jnp.allclose(tt, rtt, atol=1e-4, rtol=1e-4)

    print("KERNEL_OK")
</pallas_src>

<mosaic_0001>
module attributes {stable_mosaic.version = 11 : i64} {
  func.func @cyclenet_kernel(%arg0: i32, %arg1: memref<1x16x128xf32, #tpu.memory_space<vmem>>, %arg2: memref<1x8x128xf32, #tpu.memory_space<vmem>>, %arg3: memref<1x1x128xi32, #tpu.memory_space<vmem>>, %arg4: memref<1x1x128xi32, #tpu.memory_space<vmem>>, %arg5: memref<6x128xf32, #tpu.memory_space<vmem>>, %arg6: memref<32x16xf32, #tpu.memory_space<vmem>>, %arg7: memref<32x1xf32, #tpu.memory_space<vmem>>, %arg8: memref<8x32xf32, #tpu.memory_space<vmem>>, %arg9: memref<8x1xf32, #tpu.memory_space<vmem>>, %arg10: memref<1x24x128xf32, #tpu.memory_space<vmem>>) attributes {dimension_semantics = [#tpu.dimension_semantics<parallel>], iteration_bounds = array<i64: 1>, scalar_prefetch = 0 : i64, scratch_operands = 0 : i64, tpu.core_type = #tpu.core_type<tc>, window_params = [{transform_indices = @transform_0, window_bounds = array<i64: 1, 16, 128>}, {transform_indices = @transform_1, window_bounds = array<i64: 1, 8, 128>}, {transform_indices = @transform_2, window_bounds = array<i64: 1, 1, 128>}, {transform_indices = @transform_3, window_bounds = array<i64: 1, 1, 128>}, {pipeline_mode = #tpu.pipeline_mode<synchronous>, transform_indices = @transform_4, window_bounds = array<i64: 6, 128>}, {pipeline_mode = #tpu.pipeline_mode<synchronous>, transform_indices = @transform_5, window_bounds = array<i64: 32, 16>}, {pipeline_mode = #tpu.pipeline_mode<synchronous>, transform_indices = @transform_6, window_bounds = array<i64: 32, 1>}, {pipeline_mode = #tpu.pipeline_mode<synchronous>, transform_indices = @transform_7, window_bounds = array<i64: 8, 32>}, {pipeline_mode = #tpu.pipeline_mode<synchronous>, transform_indices = @transform_8, window_bounds = array<i64: 8, 1>}, {transform_indices = @transform_9, window_bounds = array<i64: 1, 24, 128>}]} {
    %c0 = arith.constant 0 : index
    %c0_0 = arith.constant 0 : index
    %c0_1 = arith.constant 0 : index
    %0 = vector.load %arg1[%c0, %c0_0, %c0_1] : memref<1x16x128xf32, #tpu.memory_space<vmem>>, vector<1x16x128xf32>
    %1 = vector.shape_cast %0 : vector<1x16x128xf32> to vector<16x128xf32>
    %c0_2 = arith.constant 0 : index
    %c0_3 = arith.constant 0 : index
    %c0_4 = arith.constant 0 : index
    %2 = vector.load %arg2[%c0_2, %c0_3, %c0_4] : memref<1x8x128xf32, #tpu.memory_space<vmem>>, vector<1x8x128xf32>
    %3 = vector.shape_cast %2 : vector<1x8x128xf32> to vector<8x128xf32>
    %c0_5 = arith.constant 0 : index
    %c0_6 = arith.constant 0 : index
    %c0_7 = arith.constant 0 : index
    %4 = vector.load %arg3[%c0_5, %c0_6, %c0_7] : memref<1x1x128xi32, #tpu.memory_space<vmem>>, vector<1x1x128xi32>
    %5 = vector.shape_cast %4 : vector<1x1x128xi32> to vector<1x128xi32>
    %c0_8 = arith.constant 0 : index
    %c0_9 = arith.constant 0 : index
    %c0_10 = arith.constant 0 : index
    %6 = vector.load %arg4[%c0_8, %c0_9, %c0_10] : memref<1x1x128xi32, #tpu.memory_space<vmem>>, vector<1x1x128xi32>
    %7 = vector.shape_cast %6 : vector<1x1x128xi32> to vector<1x128xi32>
    %c0_11 = arith.constant 0 : index
    %c0_12 = arith.constant 0 : index
    %8 = vector.load %arg5[%c0_11, %c0_12] : memref<6x128xf32, #tpu.memory_space<vmem>>, vector<6x128xf32>
    %cst = arith.constant dense<0.000000e+00> : vector<128xf32>
    %9 = vector.multi_reduction <add>, %1, %cst [0] : vector<16x128xf32> to vector<128xf32>
    %10 = vector.shape_cast %9 : vector<128xf32> to vector<1x128xf32>
    %cst_13 = arith.constant 1.600000e+01 : f32
    %11 = vector.broadcast %cst_13 : f32 to vector<1x128xf32>
    %12 = arith.divf %10, %11 : vector<1x128xf32>
    %13 = vector.broadcast %12 : vector<1x128xf32> to vector<16x128xf32>
    %14 = arith.subf %1, %13 : vector<16x128xf32>
    %15 = arith.mulf %14, %14 : vector<16x128xf32>
    %cst_14 = arith.constant dense<0.000000e+00> : vector<128xf32>
    %16 = vector.multi_reduction <add>, %15, %cst_14 [0] : vector<16x128xf32> to vector<128xf32>
    %17 = vector.shape_cast %16 : vector<128xf32> to vector<1x128xf32>
    %cst_15 = arith.constant 0.0666666701 : f32
    %18 = vector.broadcast %cst_15 : f32 to vector<1x128xf32>
    %19 = arith.mulf %17, %18 : vector<1x128xf32>
    %cst_16 = arith.constant 9.99999974E-6 : f32
    %20 = vector.broadcast %cst_16 : f32 to vector<1x128xf32>
    %21 = arith.addf %19, %20 : vector<1x128xf32>
    %22 = math.sqrt %21 : vector<1x128xf32>
    %23 = vector.broadcast %12 : vector<1x128xf32> to vector<16x128xf32>
    %24 = arith.subf %1, %23 : vector<16x128xf32>
    %25 = vector.broadcast %22 : vector<1x128xf32> to vector<16x128xf32>
    %26 = arith.divf %24, %25 : vector<16x128xf32>
    %27 = tpu.iota {dimensions = array<i32: 0>} : vector<16x128xi32>
    %28 = vector.broadcast %5 : vector<1x128xi32> to vector<16x128xi32>
    %29 = arith.addi %28, %27 : vector<16x128xi32>
    %c6_i32 = arith.constant 6 : i32
    %30 = vector.broadcast %c6_i32 : i32 to vector<16x128xi32>
    %31 = arith.cmpi sge, %29, %30 : vector<16x128xi32>
    %c6_i32_17 = arith.constant 6 : i32
    %32 = vector.broadcast %c6_i32_17 : i32 to vector<16x128xi32>
    %33 = arith.subi %29, %32 : vector<16x128xi32>
    %34 = arith.select %31, %33, %29 : vector<16x128xi1>, vector<16x128xi32>
    %c6_i32_18 = arith.constant 6 : i32
    %35 = vector.broadcast %c6_i32_18 : i32 to vector<16x128xi32>
    %36 = arith.cmpi sge, %34, %35 : vector<16x128xi32>
    %c6_i32_19 = arith.constant 6 : i32
    %37 = vector.broadcast %c6_i32_19 : i32 to vector<16x128xi32>
    %38 = arith.subi %34, %37 : vector<16x128xi32>
    %39 = arith.select %36, %38, %34 : vector<16x128xi1>, vector<16x128xi32>
    %c6_i32_20 = arith.constant 6 : i32
    %40 = vector.broadcast %c6_i32_20 : i32 to vector<16x128xi32>
    %41 = arith.cmpi sge, %39, %40 : vector<16x128xi32>
    %c6_i32_21 = arith.constant 6 : i32
    %42 = vector.broadcast %c6_i32_21 : i32 to vector<16x128xi32>
    %43 = arith.subi %39, %42 : vector<16x128xi32>
    %44 = arith.select %41, %43, %39 : vector<16x128xi1>, vector<16x128xi32>
    %cst_22 = arith.constant 0.000000e+00 : f32
    %45 = vector.broadcast %cst_22 : f32 to vector<16x128xf32>
    %c0_i32 = arith.constant 0 : i32
    %46 = vector.broadcast %c0_i32 : i32 to vector<16x128xi32>
    %47 = arith.cmpi eq, %44, %46 : vector<16x128xi32>
    %48 = vector.extract_strided_slice %8 {offsets = [0, 0], sizes = [1, 128], strides = [1, 1]} : vector<6x128xf32> to vector<1x128xf32>
    %49 = vector.shape_cast %48 : vector<1x128xf32> to vector<1x128xf32>
    %50 = vector.broadcast %49 : vector<1x128xf32> to vector<16x128xf32>
    %51 = arith.select %47, %50, %45 : vector<16x128xi1>, vector<16x128xf32>
    %c1_i32 = arith.constant 1 : i32
    %52 = vector.broadcast %c1_i32 : i32 to vector<16x128xi32>
    %53 = arith.cmpi eq, %44, %52 : vector<16x128xi32>
    %54 = vector.extract_strided_slice %8 {offsets = [1, 0], sizes = [1, 128], strides = [1, 1]} : vector<6x128xf32> to vector<1x128xf32>
    %55 = vector.shape_cast %54 : vector<1x128xf32> to vector<1x128xf32>
    %56 = vector.broadcast %55 : vector<1x128xf32> to vector<16x128xf32>
    %57 = arith.select %53, %56, %51 : vector<16x128xi1>, vector<16x128xf32>
    %c2_i32 = arith.constant 2 : i32
    %58 = vector.broadcast %c2_i32 : i32 to vector<16x128xi32>
    %59 = arith.cmpi eq, %44, %58 : vector<16x128xi32>
    %60 = vector.extract_strided_slice %8 {offsets = [2, 0], sizes = [1, 128], strides = [1, 1]} : vector<6x128xf32> to vector<1x128xf32>
    %61 = vector.shape_cast %60 : vector<1x128xf32> to vector<1x128xf32>
    %62 = vector.broadcast %61 : vector<1x128xf32> to vector<16x128xf32>
    %63 = arith.select %59, %62, %57 : vector<16x128xi1>, vector<16x128xf32>
    %c3_i32 = arith.constant 3 : i32
    %64 = vector.broadcast %c3_i32 : i32 to vector<16x128xi32>
    %65 = arith.cmpi eq, %44, %64 : vector<16x128xi32>
    %66 = vector.extract_strided_slice %8 {offsets = [3, 0], sizes = [1, 128], strides = [1, 1]} : vector<6x128xf32> to vector<1x128xf32>
    %67 = vector.shape_cast %66 : vector<1x128xf32> to vector<1x128xf32>
    %68 = vector.broadcast %67 : vector<1x128xf32> to vector<16x128xf32>
    %69 = arith.select %65, %68, %63 : vector<16x128xi1>, vector<16x128xf32>
    %c4_i32 = arith.constant 4 : i32
    %70 = vector.broadcast %c4_i32 : i32 to vector<16x128xi32>
    %71 = arith.cmpi eq, %44, %70 : vector<16x128xi32>
    %72 = vector.extract_strided_slice %8 {offsets = [4, 0], sizes = [1, 128], strides = [1, 1]} : vector<6x128xf32> to vector<1x128xf32>
    %73 = vector.shape_cast %72 : vector<1x128xf32> to vector<1x128xf32>
    %74 = vector.broadcast %73 : vector<1x128xf32> to vector<16x128xf32>
    %75 = arith.select %71, %74, %69 : vector<16x128xi1>, vector<16x128xf32>
    %c5_i32 = arith.constant 5 : i32
    %76 = vector.broadcast %c5_i32 : i32 to vector<16x128xi32>
    %77 = arith.cmpi eq, %44, %76 : vector<16x128xi32>
    %78 = vector.extract_strided_slice %8 {offsets = [5, 0], sizes = [1, 128], strides = [1, 1]} : vector<6x128xf32> to vector<1x128xf32>
    %79 = vector.shape_cast %78 : vector<1x128xf32> to vector<1x128xf32>
    %80 = vector.broadcast %79 : vector<1x128xf32> to vector<16x128xf32>
    %81 = arith.select %77, %80, %75 : vector<16x128xi1>, vector<16x128xf32>
    %82 = arith.subf %26, %81 : vector<16x128xf32>
    %c0_23 = arith.constant 0 : index
    %c0_24 = arith.constant 0 : index
    %83 = vector.load %arg6[%c0_23, %c0_24] : memref<32x16xf32, #tpu.memory_space<vmem>>, vector<32x16xf32>
    %cst_25 = arith.constant dense<0.000000e+00> : vector<32x128xf32>
    %84 = tpu.matmul %83, %82, %cst_25 {dimension_numbers = #tpu.dot_dimension_numbers<[1], [0], [0], [1], [0, 0, 1, 1], [], []>} : vector<32x16xf32>, vector<16x128xf32>, vector<32x128xf32> -> vector<32x128xf32>
    %c0_26 = arith.constant 0 : index
    %c0_27 = arith.constant 0 : index
    %85 = vector.load %arg7[%c0_26, %c0_27] : memref<32x1xf32, #tpu.memory_space<vmem>>, vector<32x1xf32>
    %86 = vector.broadcast %85 : vector<32x1xf32> to vector<32x128xf32>
    %87 = arith.addf %84, %86 : vector<32x128xf32>
    %cst_28 = arith.constant 0.000000e+00 : f32
    %88 = vector.broadcast %cst_28 : f32 to vector<32x128xf32>
    %89 = arith.maximumf %87, %88 : vector<32x128xf32>
    %c0_29 = arith.constant 0 : index
    %c0_30 = arith.constant 0 : index
    %90 = vector.load %arg8[%c0_29, %c0_30] : memref<8x32xf32, #tpu.memory_space<vmem>>, vector<8x32xf32>
    %cst_31 = arith.constant dense<0.000000e+00> : vector<8x128xf32>
    %91 = tpu.matmul %90, %89, %cst_31 {dimension_numbers = #tpu.dot_dimension_numbers<[1], [0], [0], [1], [0, 0, 1, 1], [], []>} : vector<8x32xf32>, vector<32x128xf32>, vector<8x128xf32> -> vector<8x128xf32>
    %c0_32 = arith.constant 0 : index
    %c0_33 = arith.constant 0 : index
    %92 = vector.load %arg9[%c0_32, %c0_33] : memref<8x1xf32, #tpu.memory_space<vmem>>, vector<8x1xf32>
    %93 = vector.broadcast %92 : vector<8x1xf32> to vector<8x128xf32>
    %94 = arith.addf %91, %93 : vector<8x128xf32>
    %95 = tpu.iota {dimensions = array<i32: 0>} : vector<8x128xi32>
    %96 = vector.broadcast %7 : vector<1x128xi32> to vector<8x128xi32>
    %97 = arith.addi %96, %95 : vector<8x128xi32>
    %c6_i32_34 = arith.constant 6 : i32
    %98 = vector.broadcast %c6_i32_34 : i32 to vector<8x128xi32>
    %99 = arith.cmpi sge, %97, %98 : vector<8x128xi32>
    %c6_i32_35 = arith.constant 6 : i32
    %100 = vector.broadcast %c6_i32_35 : i32 to vector<8x128xi32>
    %101 = arith.subi %97, %100 : vector<8x128xi32>
    %102 = arith.select %99, %101, %97 : vector<8x128xi1>, vector<8x128xi32>
    %c6_i32_36 = arith.constant 6 : i32
    %103 = vector.broadcast %c6_i32_36 : i32 to vector<8x128xi32>
    %104 = arith.cmpi sge, %102, %103 : vector<8x128xi32>
    %c6_i32_37 = arith.constant 6 : i32
    %105 = vector.broadcast %c6_i32_37 : i32 to vector<8x128xi32>
    %106 = arith.subi %102, %105 : vector<8x128xi32>
    %107 = arith.select %104, %106, %102 : vector<8x128xi1>, vector<8x128xi32>
    %cst_38 = arith.constant 0.000000e+00 : f32
    %108 = vector.broadcast %cst_38 : f32 to vector<8x128xf32>
    %c0_i32_39 = arith.constant 0 : i32
    %109 = vector.broadcast %c0_i32_39 : i32 to vector<8x128xi32>
    %110 = arith.cmpi eq, %107, %109 : vector<8x128xi32>
    %111 = vector.extract_strided_slice %8 {offsets = [0, 0], sizes = [1, 128], strides = [1, 1]} : vector<6x128xf32> to vector<1x128xf32>
    %112 = vector.shape_cast %111 : vector<1x128xf32> to vector<1x128xf32>
    %113 = vector.broadcast %112 : vector<1x128xf32> to vector<8x128xf32>
    %114 = arith.select %110, %113, %108 : vector<8x128xi1>, vector<8x128xf32>
    %c1_i32_40 = arith.constant 1 : i32
    %115 = vector.broadcast %c1_i32_40 : i32 to vector<8x128xi32>
    %116 = arith.cmpi eq, %107, %115 : vector<8x128xi32>
    %117 = vector.extract_strided_slice %8 {offsets = [1, 0], sizes = [1, 128], strides = [1, 1]} : vector<6x128xf32> to vector<1x128xf32>
    %118 = vector.shape_cast %117 : vector<1x128xf32> to vector<1x128xf32>
    %119 = vector.broadcast %118 : vector<1x128xf32> to vector<8x128xf32>
    %120 = arith.select %116, %119, %114 : vector<8x128xi1>, vector<8x128xf32>
    %c2_i32_41 = arith.constant 2 : i32
    %121 = vector.broadcast %c2_i32_41 : i32 to vector<8x128xi32>
    %122 = arith.cmpi eq, %107, %121 : vector<8x128xi32>
    %123 = vector.extract_strided_slice %8 {offsets = [2, 0], sizes = [1, 128], strides = [1, 1]} : vector<6x128xf32> to vector<1x128xf32>
    %124 = vector.shape_cast %123 : vector<1x128xf32> to vector<1x128xf32>
    %125 = vector.broadcast %124 : vector<1x128xf32> to vector<8x128xf32>
    %126 = arith.select %122, %125, %120 : vector<8x128xi1>, vector<8x128xf32>
    %c3_i32_42 = arith.constant 3 : i32
    %127 = vector.broadcast %c3_i32_42 : i32 to vector<8x128xi32>
    %128 = arith.cmpi eq, %107, %127 : vector<8x128xi32>
    %129 = vector.extract_strided_slice %8 {offsets = [3, 0], sizes = [1, 128], strides = [1, 1]} : vector<6x128xf32> to vector<1x128xf32>
    %130 = vector.shape_cast %129 : vector<1x128xf32> to vector<1x128xf32>
    %131 = vector.broadcast %130 : vector<1x128xf32> to vector<8x128xf32>
    %132 = arith.select %128, %131, %126 : vector<8x128xi1>, vector<8x128xf32>
    %c4_i32_43 = arith.constant 4 : i32
    %133 = vector.broadcast %c4_i32_43 : i32 to vector<8x128xi32>
    %134 = arith.cmpi eq, %107, %133 : vector<8x128xi32>
    %135 = vector.extract_strided_slice %8 {offsets = [4, 0], sizes = [1, 128], strides = [1, 1]} : vector<6x128xf32> to vector<1x128xf32>
    %136 = vector.shape_cast %135 : vector<1x128xf32> to vector<1x128xf32>
    %137 = vector.broadcast %136 : vector<1x128xf32> to vector<8x128xf32>
    %138 = arith.select %134, %137, %132 : vector<8x128xi1>, vector<8x128xf32>
    %c5_i32_44 = arith.constant 5 : i32
    %139 = vector.broadcast %c5_i32_44 : i32 to vector<8x128xi32>
    %140 = arith.cmpi eq, %107, %139 : vector<8x128xi32>
    %141 = vector.extract_strided_slice %8 {offsets = [5, 0], sizes = [1, 128], strides = [1, 1]} : vector<6x128xf32> to vector<1x128xf32>
    %142 = vector.shape_cast %141 : vector<1x128xf32> to vector<1x128xf32>
    %143 = vector.broadcast %142 : vector<1x128xf32> to vector<8x128xf32>
    %144 = arith.select %140, %143, %138 : vector<8x128xi1>, vector<8x128xf32>
    %145 = arith.addf %94, %144 : vector<8x128xf32>
    %146 = arith.subf %3, %144 : vector<8x128xf32>
    %147 = vector.broadcast %22 : vector<1x128xf32> to vector<8x128xf32>
    %148 = arith.mulf %145, %147 : vector<8x128xf32>
    %149 = vector.broadcast %12 : vector<1x128xf32> to vector<8x128xf32>
    %150 = arith.addf %148, %149 : vector<8x128xf32>
    %c0_45 = arith.constant 0 : index
    %c0_46 = arith.constant 0 : index
    %c0_47 = arith.constant 0 : index
    %151 = vector.load %arg10[%c0_45, %c0_46, %c0_47] : memref<1x24x128xf32, #tpu.memory_space<vmem>>, vector<1x8x128xf32>
    %152 = vector.shape_cast %151 : vector<1x8x128xf32> to vector<8x128xf32>
    %153 = vector.shape_cast %150 : vector<8x128xf32> to vector<1x8x128xf32>
    tpu.vector_store %arg10[%c0_45, %c0_46, %c0_47], %153 {strides = array<i32>} : memref<1x24x128xf32, #tpu.memory_space<vmem>>, vector<1x8x128xf32>,
    %154 = vector.broadcast %22 : vector<1x128xf32> to vector<8x128xf32>
    %155 = arith.mulf %94, %154 : vector<8x128xf32>
    %156 = vector.broadcast %12 : vector<1x128xf32> to vector<8x128xf32>
    %157 = arith.addf %155, %156 : vector<8x128xf32>
    %c0_48 = arith.constant 0 : index
    %c8 = arith.constant 8 : index
    %c0_49 = arith.constant 0 : index
    %158 = vector.load %arg10[%c0_48, %c8, %c0_49] : memref<1x24x128xf32, #tpu.memory_space<vmem>>, vector<1x8x128xf32>
    %159 = vector.shape_cast %158 : vector<1x8x128xf32> to vector<8x128xf32>
    %160 = vector.shape_cast %157 : vector<8x128xf32> to vector<1x8x128xf32>
    tpu.vector_store %arg10[%c0_48, %c8, %c0_49], %160 {strides = array<i32>} : memref<1x24x128xf32, #tpu.memory_space<vmem>>, vector<1x8x128xf32>,
    %161 = vector.broadcast %22 : vector<1x128xf32> to vector<8x128xf32>
    %162 = arith.mulf %146, %161 : vector<8x128xf32>
    %163 = vector.broadcast %12 : vector<1x128xf32> to vector<8x128xf32>
    %164 = arith.addf %162, %163 : vector<8x128xf32>
    %c0_50 = arith.constant 0 : index
    %c16 = arith.constant 16 : index
    %c0_51 = arith.constant 0 : index
    %165 = vector.load %arg10[%c0_50, %c16, %c0_51] : memref<1x24x128xf32, #tpu.memory_space<vmem>>, vector<1x8x128xf32>
    %166 = vector.shape_cast %165 : vector<1x8x128xf32> to vector<8x128xf32>
    %167 = vector.shape_cast %164 : vector<8x128xf32> to vector<1x8x128xf32>
    tpu.vector_store %arg10[%c0_50, %c16, %c0_51], %167 {strides = array<i32>} : memref<1x24x128xf32, #tpu.memory_space<vmem>>, vector<1x8x128xf32>,
    return
  }
  func.func @transform_0(%arg0: i32) -> (i32, i32, i32) {
    %c0_i32 = arith.constant 0 : i32
    %c0_i32_0 = arith.constant 0 : i32
    %c0_i32_1 = arith.constant 0 : i32
    return %arg0, %c0_i32, %c0_i32_0 : i32, i32, i32
  }
  func.func @transform_1(%arg0: i32) -> (i32, i32, i32) {
    %c0_i32 = arith.constant 0 : i32
    %c0_i32_0 = arith.constant 0 : i32
    %c0_i32_1 = arith.constant 0 : i32
    return %arg0, %c0_i32, %c0_i32_0 : i32, i32, i32
  }
  func.func @transform_2(%arg0: i32) -> (i32, i32, i32) {
    %c0_i32 = arith.constant 0 : i32
    %c0_i32_0 = arith.constant 0 : i32
    %c0_i32_1 = arith.constant 0 : i32
    return %arg0, %c0_i32, %c0_i32_0 : i32, i32, i32
  }
  func.func @transform_3(%arg0: i32) -> (i32, i32, i32) {
    %c0_i32 = arith.constant 0 : i32
    %c0_i32_0 = arith.constant 0 : i32
    %c0_i32_1 = arith.constant 0 : i32
    return %arg0, %c0_i32, %c0_i32_0 : i32, i32, i32
  }
  func.func @transform_4(%arg0: i32) -> (i32, i32) {
    %c0_i32 = arith.constant 0 : i32
    %c0_i32_0 = arith.constant 0 : i32
    %c0_i32_1 = arith.constant 0 : i32
    return %c0_i32, %c0_i32_0 : i32, i32
  }
  func.func @transform_5(%arg0: i32) -> (i32, i32) {
    %c0_i32 = arith.constant 0 : i32
    %c0_i32_0 = arith.constant 0 : i32
    %c0_i32_1 = arith.constant 0 : i32
    return %c0_i32, %c0_i32_0 : i32, i32
  }
  func.func @transform_6(%arg0: i32) -> (i32, i32) {
    %c0_i32 = arith.constant 0 : i32
    %c0_i32_0 = arith.constant 0 : i32
    %c0_i32_1 = arith.constant 0 : i32
    return %c0_i32, %c0_i32_0 : i32, i32
  }
  func.func @transform_7(%arg0: i32) -> (i32, i32) {
    %c0_i32 = arith.constant 0 : i32
    %c0_i32_0 = arith.constant 0 : i32
    %c0_i32_1 = arith.constant 0 : i32
    return %c0_i32, %c0_i32_0 : i32, i32
  }
  func.func @transform_8(%arg0: i32) -> (i32, i32) {
    %c0_i32 = arith.constant 0 : i32
    %c0_i32_0 = arith.constant 0 : i32
    %c0_i32_1 = arith.constant 0 : i32
    return %c0_i32, %c0_i32_0 : i32, i32
  }
  func.func @transform_9(%arg0: i32) -> (i32, i32, i32) {
    %c0_i32 = arith.constant 0 : i32
    %c0_i32_0 = arith.constant 0 : i32
    %c0_i32_1 = arith.constant 0 : i32
    return %arg0, %c0_i32, %c0_i32_0 : i32, i32, i32
  }
}

</mosaic_0001>

<bundles_post_ra>
// kernel: tpu_custom_call.1
= control target key start
LH: loop header
LB: loop body
LE: loop exit
PB: predicated region body
PF: predicated region fallthrough
CT: control target
= control target key end

     0   :  { %vm176_vm0 = vcmask 130048   ;;  %v490_v4 = vmov 0   ;;  %s665_s0 = inlined_call_operand.vmem [shape: f32[1,16,128], index: 0, kind: input, shape index: {}]   ;;  %s666_s1 = inlined_call_operand.vmem [shape: f32[1,8,128], index: 1, kind: input, shape index: {}]   ;;  %s667_s2 = inlined_call_operand.vmem [shape: s32[1,1,128], index: 2, kind: input, shape index: {}]   ;;  %s668_s3 = inlined_call_operand.vmem [shape: s32[1,1,128], index: 3, kind: input, shape index: {}]   ;;  %s669_s4 = inlined_call_operand.vmem [shape: f32[6,128], index: 4, kind: input, shape index: {}]   ;;  %s670_s5 = inlined_call_operand.vmem [shape: f32[32,16], index: 5, kind: input, shape index: {}]   ;;  %s671_s6 = inlined_call_operand.vmem [shape: f32[32,1], index: 6, kind: input, shape index: {}]   ;;  %s672_s7 = inlined_call_operand.vmem [shape: f32[8,32], index: 7, kind: input, shape index: {}]   ;;  %s673_s8 = inlined_call_operand.vmem [shape: f32[8,1], index: 8, kind: input, shape index: {}]   ;;  %s674_s9 = inlined_call_operand.hbm [shape: f32[1,24,128], index: 9, kind: output, shape index: {}]  }
   0x1   :  { %v33_v0 = vld [vmem:[%s665_s0] sm:$0xff]  ;;  %v34_v1 = vld [vmem:[%s665_s0 + $0x8] sm:$0xff]  ;;  %462 = vset.pattern.permute.xlu0 %v490_v4  ;;  %463 = vset.pattern.permute.xlu1 %v490_v4  ;;  %v155_v5 = vld [vmem:[%s671_s6 + $0x18] sm:$0xff] }
   0x2   :  { %v39_v2 = vadd.f32 %v34_v1, %v33_v0  ;;  %v148_v3 = vld [vmem:[%s670_s5] sm:$0xff]  ;;  %173 = vperm.xlu0 %462, %v155_v5   ;;  %v153_v7 = vld [vmem:[%s671_s6 + $0x8] sm:$0xff]  ;;  %v154_v8 = vld [vmem:[%s671_s6 + $0x10] sm:$0xff] }
   0x3   :  { %439 = vmatprep.mubr.msk.f32.mxu0 %vm176_vm0, %v148_v3  ;;  %163 = vperm.xlu1 %463, %v153_v7  }
   0x4   :  { %v40_v6 = vrot.slane %v39_v2, 4 }
   0x5   :  { %14 = vsyncpa [#allocation3], 0  ;;  %v152_v10 = vld [vmem:[%s671_s6] sm:$0xff]  ;;  %v71_v17 = vlaneseq }
   0x6   :  { %v41_v9 = vadd.f32 %v40_v6, %v39_v2  ;;  %168 = vperm.xlu0 %462, %v154_v8   ;;  %v279_v12 = vld [vmem:[%s673_s8] sm:$0xff] }
   0x7   :  { %158 = vperm.xlu1 %463, %v152_v10   ;;  %v583_v22 = vshrl.u32 %v71_v17, 7  ;;  %v409_v26 = vld [vmem:[%s667_s2] ss:$0 sm:$0xff] }
   0x8   :  { %v42_v11 = vrot.slane %v41_v9, 2  ;;  %v38_v47 = vld [vmem:[%s669_s4] sm:$0x3f] }
   0x9   :  { %v73_v25 = vadd.s32 8, %v583_v22  ;;  %v78_v29 = vadd.s32 %v409_v26, %v583_v22  ;;  %v102_v46 = vsub.s32 0, %v583_v22  ;;  %v110_v50 = vsub.s32 1, %v583_v22 }
   0xa   :  { %v43_v13 = vadd.f32 %v42_v11, %v41_v9  ;;  %282 = vperm.xlu0 %462, %v279_v12   ;;  %v118_v55 = vsub.s32 2, %v583_v22  ;;  %v126_v61 = vsub.s32 3, %v583_v22  ;;  %v142_v5 = vsub.s32 5, %v583_v22 }
   0xb   :  { %v79_v30 = vadd.s32 %v409_v26, %v73_v25  ;;  %v410_v34 = vadd.s32 4294967290, %v78_v29  ;;  %vm80_vm2 = vcmp.ge.s32.totalorder %v78_v29, 6  ;;  %v595_v51 = vrot.slane %v38_v47, %v102_v46 }
   0xc   :  { %v44_v14 = vrot.slane %v43_v13, 1  ;;  %v598_v56 = vrot.slane %v38_v47, %v110_v50  ;;  %v606_v62 = vrot.slane %v38_v47, %v118_v55  ;;  %v611_v2 = vrot.slane %v38_v47, %v126_v61 }
   0xd   :  { %v411_v33 = vadd.s32 4294967290, %v79_v30  ;;  %vm81_vm1 = vcmp.ge.s32.totalorder %v79_v30, 6  ;;  %v84_v38 = vsel %vm80_vm2, %v410_v34, %v78_v29  ;;  %v620_v9 = vrot.slane %v38_v47, %v142_v5 }
   0xe   :  { %v45_v15 = vadd.f32 %v44_v14, %v43_v13  ;;  %v412_v41 = vadd.s32 4294967290, %v84_v38  ;;  %vm86_vm4 = vcmp.ge.s32.totalorder %v84_v38, 6 }
   0xf   :  { %v85_v37 = vsel %vm81_vm1, %v411_v33, %v79_v30 }
  0x10   :  { %v571_v16 = vmul.f32 0.0625, %v45_v15  ;;  %v413_v40 = vadd.s32 4294967290, %v85_v37  ;;  %vm87_vm3 = vcmp.ge.s32.totalorder %v85_v37, 6  ;;  %v90_v43 = vsel %vm86_vm4, %v412_v41, %v84_v38  ;;  %v278_v41 = vld [vmem:[%s672_s7] sm:$0xff] }
  0x11   :  { %v414_v45 = vadd.s32 4294967290, %v90_v43  ;;  %vm92_vm6 = vcmp.ge.s32.totalorder %v90_v43, 6 }
  0x12   :  { %v574_v18 = vsub.f32 %v33_v0, %v571_v16  ;;  %v577_v19 = vsub.f32 %v34_v1, %v571_v16  ;;  %v91_v42 = vsel %vm87_vm3, %v413_v40, %v85_v37  ;;  %v134_v1 = vsub.s32 4, %v583_v22 }
  0x13   :  { %v415_v44 = vadd.s32 4294967290, %v91_v42  ;;  %vm93_vm5 = vcmp.ge.s32.totalorder %v91_v42, 6  ;;  %v96_v49 = vsel %vm92_vm6, %v414_v45, %v90_v43  ;;  %vm492_vm6 = vmmov 0  }
  0x14   :  { %v50_v20 = vmul.f32 %v574_v18, %v574_v18  ;;  %v51_v21 = vmul.f32 %v577_v19, %v577_v19  ;;  %vm98_vm9 = vcmp.eq.s32.totalorder %v96_v49, 0  ;;  %vm106_vm12 = vcmp.eq.s32.totalorder %v96_v49, 1 }
  0x15   :  { %v97_v48 = vsel %vm93_vm5, %v415_v44, %v91_v42  ;;  %v104_v59 = vsel %vm98_vm9, %v595_v51, 0.0  ;;  %vm114_vm14 = vcmp.eq.s32.totalorder %v96_v49, 2  ;;  %vm122_vm1 = vcmp.eq.s32.totalorder %v96_v49, 3  ;;  %v421_v42 = vld [vmem:[%s668_s3] ss:$0 sm:$0xff] }
  0x16   :  { %v52_v23 = vadd.f32 %v51_v21, %v50_v20  ;;  %vm99_vm8 = vcmp.eq.s32.totalorder %v97_v48, 0  ;;  %vm107_vm11 = vcmp.eq.s32.totalorder %v97_v48, 1  ;;  %vm115_vm13 = vcmp.eq.s32.totalorder %v97_v48, 2 }
  0x17   :  { %v105_v58 = vsel %vm99_vm8, %v595_v51, 0.0  ;;  %v112_v0 = vsel %vm106_vm12, %v598_v56, %v104_v59  ;;  %vm123_vm15 = vcmp.eq.s32.totalorder %v97_v48, 3  ;;  %v616_v6 = vrot.slane %v38_v47, %v134_v1 }
  0x18   :  { %v53_v24 = vrot.slane %v52_v23, 4  ;;  %v113_v63 = vsel %vm107_vm11, %v598_v56, %v105_v58  ;;  %v120_v4 = vsel %vm114_vm14, %v606_v62, %v112_v0  ;;  %vm131_vm2 = vcmp.eq.s32.totalorder %v97_v48, 4 }
  0x19   :  { %v121_v3 = vsel %vm115_vm13, %v606_v62, %v113_v63  ;;  %v128_v8 = vsel %vm122_vm1, %v611_v2, %v120_v4  ;;  %vm130_vm3 = vcmp.eq.s32.totalorder %v96_v49, 4  ;;  %vm139_vm4 = vcmp.eq.s32.totalorder %v97_v48, 5 }
  0x1a   :  { %v54_v27 = vadd.f32 %v53_v24, %v52_v23  ;;  %v129_v7 = vsel %vm123_vm15, %v611_v2, %v121_v3  ;;  %v136_v11 = vsel %vm130_vm3, %v616_v6, %v128_v8  ;;  %vm138_vm5 = vcmp.eq.s32.totalorder %v96_v49, 5  ;;  %v149_v23 = vld [vmem:[%s670_s5 + $0x8] sm:$0xff]  ;;  %v150_v24 = vld [vmem:[%s670_s5 + $0x10] sm:$0xff] }
  0x1b   :  { %v137_v10 = vsel %vm131_vm2, %v616_v6, %v129_v7  ;;  %v144_v14 = vsel %vm138_vm5, %v620_v9, %v136_v11  ;;  %v363_v43 = vadd.s32 %v421_v42, %v583_v22  ;;  %v35_v22 = vld [vmem:[%s666_s1] sm:$0xff]  ;;  %s493_s1 = smov [#allocation2]  }
  0x1c   :  { %v55_v28 = vrot.slane %v54_v27, 2  ;;  %v145_v13 = vsel %vm139_vm4, %v620_v9, %v137_v10  ;;  %s398_s12 = sshll.u32 %s493_s1, 4  ;;  %s399_s12 = int_to_ptr.vmem [resolvable:$true] %s398_s12 }
  0x1d   :  { %v422_v44 = vadd.s32 4294967290, %v363_v43  ;;  %s468_s13 = scalar_lea.vmem %s399_s12, 384  ;;  %p473_p1 = scmp.lt.s32.totalorder %s399_s12, %s399_s12 }
  0x1e   :  { %v56_v31 = vadd.f32 %v55_v28, %v54_v27  ;;  %p469_p0 = scmp.ne.s32.totalorder %s399_s12, %s468_s13  ;;  %p474_p2 = scmp.lt.s32.totalorder %s468_s13, %s468_s13 }
  0x20   :  { %v57_v32 = vrot.slane %v56_v31, 1  ;;  %p475_p3 = por %p474_p2, %p473_p1 }
  0x22   :  { %v58_v35 = vadd.f32 %v57_v32, %v56_v31  ;;  %p476_p4 = pnand %p475_p3, %p469_p0 }
  0x24   :  { %v59_v36 = vmul.f32 0.06666667, %v58_v35 }
  0x26   :  { %v60_v39 = vadd.f32 1e-05, %v59_v36 }
  0x28   :  { %464 = vrsqrt.f32 %v60_v39  ;;  %vm63_vm7 = vcmp.eq.f32.partialorder %v60_v39, inf  ;;  %v66_v53 = vand.u32 2147483648, %v60_v39  ;;  %vm65_vm10 = vcmp.eq.f32.partialorder %v60_v39, 0.0 }
  0x35   :  { %v465_v52 = vpop.eup %464 }
  0x36   :  { %v62_v54 = vmul.f32 %v465_v52, %v60_v39 }
  0x38   :  { %v64_v57 = vsel %vm63_vm7, %v60_v39, %v62_v54  ;;  %vm364_vm7 = vcmp.ge.s32.totalorder %v363_v43, 6 }
  0x39   :  { %v602_v60 = vsel %vm65_vm10, %v66_v53, %v64_v57  ;;  %v366_v45 = vsel %vm364_vm7, %v422_v44, %v363_v43 }
  0x3a   :  { %466 = vrcp.f32 %v602_v60  ;;  %v423_v46 = vadd.s32 4294967290, %v366_v45  ;;  %vm367_vm8 = vcmp.ge.s32.totalorder %v366_v45, 6 }
  0x3c   :  { %v369_v47 = vsel %vm367_vm8, %v423_v46, %v366_v45 }
  0x3d   :  { %vm370_vm9 = vcmp.eq.s32.totalorder %v369_v47, 0  ;;  %vm372_vm10 = vcmp.eq.s32.totalorder %v369_v47, 1  ;;  %vm374_vm11 = vcmp.eq.s32.totalorder %v369_v47, 2  ;;  %vm376_vm12 = vcmp.eq.s32.totalorder %v369_v47, 3 }
  0x3e   :  { %v371_v48 = vsel %vm370_vm9, %v595_v51, 0.0  ;;  %vm378_vm13 = vcmp.eq.s32.totalorder %v369_v47, 4  ;;  %vm380_vm14 = vcmp.eq.s32.totalorder %v369_v47, 5 }
  0x3f   :  { %v373_v49 = vsel %vm372_vm10, %v598_v56, %v371_v48 }
  0x40   :  { %v375_v50 = vsel %vm374_vm11, %v606_v62, %v373_v49 }
  0x41   :  { %v377_v52 = vsel %vm376_vm12, %v611_v2, %v375_v50 }
  0x42   :  { %v379_v53 = vsel %vm378_vm13, %v616_v6, %v377_v52 }
  0x43   :  { %v381_v54 = vsel %vm380_vm14, %v620_v9, %v379_v53 }
  0x44   :  { %v383_v51 = vsub.f32 %v35_v22, %v381_v54 }
  0x46   :  { %v390_v55 = vmul.f32 %v383_v51, %v602_v60 }
  0x47   :  { %v467_v12 = vpop.eup %466 }
  0x48   :  { %v70_v15 = vmul.f32 %v467_v12, %v577_v19  ;;  %v69_v17 = vmul.f32 %v467_v12, %v574_v18  ;;  %v151_v18 = vld [vmem:[%s670_s5 + $0x18] sm:$0xff]  ;;  %v491_v19 = vmov 0.0   ;;  %v391_v56 = vadd.f32 %v390_v55, %v571_v16 }
  0x49   :  { %445 = vmatprep.subr.mxu1 %v491_v19  ;;  %453 = vmatprep.mubr.msk.f32.mxu1 %vm492_vm6, %v491_v19 }
  0x4a   :  { %v147_v20 = vsub.f32 %v70_v15, %v145_v13  ;;  %v146_v21 = vsub.f32 %v69_v17, %v144_v14  ;;  %392 = vst [vmem:[#allocation2 + $0x10] sm:$0xff] %v391_v56 }
  0x4c   :  { %435 = vmatprep.subr.mxu0 %v147_v20 }
  0x4d   :  { %436 = vmatpush3.msra.mxu0 %v147_v20 }
  0x4e   :  { %437 = vmatprep.subr.mxu0 %v146_v21 }
  0x4f   :  { %438 = vmatpush3.msra.mxu0 %v146_v21 }
  0x50   :  { %440 = vmatmul.mubr.msk.f32.vlgmr.msra.gmra.mxu0 %vm176_vm0, %v149_v23 }
  0x51   :  { %442 = vmatprep.mubr.msk.f32.mxu0 %vm176_vm0, %v150_v24 }
  0x54   :  { %443 = vmatmul.mubr.msk.f32.gmra.mxu0 %vm176_vm0, %v151_v18  ;;  %vm285_vm0 = vcmask 261120  }
  0x7d   :  { %v174_v25 = vpop.permute.xlu0 %173 }
  0x7e   :  { %v164_v26 = vpop.permute.xlu1 %163 }
  0x81   :  { %v169_v30 = vpop.permute.xlu0 %168 }
  0x82   :  { %v159_v32 = vpop.permute.xlu1 %158 }
  0x85   :  { %v283_v57 = vpop.permute.xlu0 %282 }
 0x110   :  { %v441_v27 = vpop.f32.mrf.mxu0 }
 0x111   :  { %v261_v34 = vadd.f32 %v441_v27, %v164_v26 }
 0x112   :  { %v255_v28 = vpop.f32.mrf.mxu0 }
 0x113   :  { %v256_v37 = vadd.f32 %v255_v28, %v159_v32  ;;  %v275_v39 = vmax.f32 %v261_v34, 0.0 }
 0x114   :  { %v444_v29 = vpop.f32.mrf.mxu0 }
 0x115   :  { %v271_v31 = vadd.f32 %v444_v29, %v174_v25  ;;  %v274_v40 = vmax.f32 %v256_v37, 0.0 }
 0x116   :  { %v265_v33 = vpop.f32.mrf.mxu0 }
 0x117   :  { %v277_v35 = vmax.f32 %v271_v31, 0.0  ;;  %v266_v36 = vadd.f32 %v265_v33, %v169_v30 }
 0x119   :  { %v276_v38 = vmax.f32 %v266_v36, 0.0  ;;  %446 = vmatpush3.msra.mxu1 %v277_v35 }
 0x11a   :  { %447 = vmatprep.subr.mxu1 %v491_v19 }
 0x11b   :  { %448 = vmatpush3.msra.mxu1 %v276_v38 }
 0x11c   :  { %449 = vmatprep.subr.mxu1 %v491_v19 }
 0x11d   :  { %450 = vmatpush3.msra.mxu1 %v275_v39 }
 0x11e   :  { %451 = vmatprep.subr.mxu1 %v491_v19 }
 0x11f   :  { %452 = vmatpush3.msra.mxu1 %v274_v40 }
 0x120   :  { %454 = vmatmul.mubr.msk.f32.vlgmr.msra.gmra.mxu1 %vm285_vm0, %v278_v41 }
 0x1e0   :  { %v355_v58 = vpop.f32.mrf.mxu1 }
 0x1e1   :  { %v356_v59 = vadd.f32 %v355_v58, %v283_v57 }
 0x1e2   :  { %v455_v61 = vpop.f32.mrf.mxu1 }
 0x1e3   :  { %v382_v62 = vadd.f32 %v381_v54, %v356_v59  ;;  %v387_v63 = vmul.f32 %v356_v59, %v602_v60 }
 0x1e5   :  { %v384_v0 = vmul.f32 %v382_v62, %v602_v60  ;;  %v388_v1 = vadd.f32 %v387_v63, %v571_v16 }
 0x1e7   :  { %v385_v2 = vadd.f32 %v384_v0, %v571_v16  ;;  %389 = vst [vmem:[#allocation2 + $0x8] sm:$0xff] %v388_v1 }
 0x1e9   :  { %386 = vst [vmem:[#allocation2] sm:$0xff] %v385_v2 }
 0x1ea   :  { %479 = shalt.err (!%p476_p4)
}
 0x1eb   :  { %s494_s14 = smov 128   ;;  %s495_s15 = smov 8  }
 0x1ec   :  { %404 = dma.vmem_to_hbm [thread:$0]  %s399_s12, 384, %s674_s9, [#allocation3], %s494_s14, %s494_s14, %s495_s15  }
 0x1ed   :  { %488 = dma.done.wait [#allocation3], 384  }
 0x1ee   :  { %489 = vsyncadd [#allocation3], 4294966912 }
 0x1ef   :  { %408 = vsyncpa [#allocation3], 1 }

</bundles_post_ra>
